<compile_context>
chip_gen: v7x
topology: tpu7x:2x2x1
jax: 0.10.0
libtpu: 0.0.40
codegen_flags: <defaults>
</compile_context>

<pallas_src>
import jax
import jax.numpy as jnp
from jax import lax
from jax.experimental import pallas as pl
from jax.experimental.pallas import tpu as pltpu


def _round_up(x, m):
    return ((x + m - 1) // m) * m


def _vae_loss_kernel(xr_ref, x_ref, mu_ref, lv_ref, out_ref, acc_ref):
    p = pl.program_id(0)
    k = pl.program_id(1)
    k_last = pl.num_programs(1) - 1

    @pl.when(k == 0)
    def _init():
        acc_ref[...] = jnp.zeros_like(acc_ref)

    # MSE partial: cast to f32 inside the kernel (inputs arrive native dtype).
    diff = xr_ref[...].astype(jnp.float32) - x_ref[...].astype(jnp.float32)
    sq = diff * diff
    tb, lanes = sq.shape
    # Fold (tb, lanes) -> (8, lanes) with elementwise vreg adds (VPU only);
    # the expensive cross-lane reduce is deferred to outside the kernel.
    acc_ref[...] += sq.reshape(tb // 8, 8, lanes).sum(axis=0)

    @pl.when(k == k_last)
    def _finalize():
        mu = mu_ref[...].astype(jnp.float32)
        lv = lv_ref[...].astype(jnp.float32)
        kld = -0.5 * jnp.sum(1.0 + lv - mu * mu - jnp.exp(lv))
        # Only parallel block 0 contributes the KL term (added once into
        # element [0, 0] of its partial via a full-block masked add).
        kld = jnp.where(p == 0, kld, 0.0)
        r = lax.broadcasted_iota(jnp.int32, acc_ref.shape, 0)
        c = lax.broadcasted_iota(jnp.int32, acc_ref.shape, 1)
        out_ref[...] = acc_ref[...] + jnp.where((r == 0) & (c == 0), kld, 0.0)


def custom_loss(x_recon, x, mu, logvar):
    """Pallas implementation of CustomLoss.forward. Returns a scalar f32."""
    E = int(x.size)

    # Lane-dense 2-D view of the dominant MSE streams, (8,128)-aligned tiles.
    lanes = 1024 if E >= 64 * 1024 else 128
    rows_needed = -(-E // lanes)
    tb = 512 if rows_needed >= 512 else _round_up(rows_needed, 8)
    rows = _round_up(rows_needed, tb)

    xr_flat = x_recon.reshape(-1)
    x_flat = x.reshape(-1)
    pad = rows * lanes - E
    if pad:
        # Zero pads on BOTH streams -> diff == 0 -> no contribution to the sum.
        xr_flat = jnp.pad(xr_flat, (0, pad))
        x_flat = jnp.pad(x_flat, (0, pad))
    xr2 = xr_flat.reshape(rows, lanes)
    x2 = x_flat.reshape(rows, lanes)

    # Split row-tiles into P parallel partial-sum blocks x K reduction steps.
    T = rows // tb
    P = 1
    for cand in (8, 4, 2):
        if T % cand == 0:
            P = cand
            break
    K = T // P

    mu2 = mu.reshape(1, -1)
    lv2 = logvar.reshape(1, -1)

    partials = pl.pallas_call(
        _vae_loss_kernel,
        out_shape=jax.ShapeDtypeStruct((P * 8, lanes), jnp.float32),
        grid_spec=pltpu.PrefetchScalarGridSpec(
            num_scalar_prefetch=0,
            grid=(P, K),
            in_specs=[
                pl.BlockSpec((tb, lanes), lambda p, k: (p * K + k, 0)),  # x_recon
                pl.BlockSpec((tb, lanes), lambda p, k: (p * K + k, 0)),  # x
                pl.BlockSpec(mu2.shape, lambda p, k: (0, 0)),  # mu (resident)
                pl.BlockSpec(lv2.shape, lambda p, k: (0, 0)),  # logvar (resident)
            ],
            out_specs=pl.BlockSpec((8, lanes), lambda p, k: (p, 0)),
            scratch_shapes=[pltpu.VMEM((8, lanes), jnp.float32)],
        ),
        compiler_params=pltpu.CompilerParams(
            dimension_semantics=("parallel", "arbitrary")),
    )(xr2, x2, mu2, lv2)

    # Single cross-lane reduce of the tiny (P*8, lanes) partial-sum slab.
    return jnp.sum(partials)


def _ref_loss(x_recon, x, mu, logvar):
    """Pure-JAX reference mirroring the PyTorch module."""
    loss_mse = jnp.sum((x_recon.astype(jnp.float32) - x.astype(jnp.float32)) ** 2)
    mu = mu.astype(jnp.float32)
    logvar = logvar.astype(jnp.float32)
    loss_kld = -0.5 * jnp.sum(1.0 + logvar - mu**2 - jnp.exp(logvar))
    return loss_mse + loss_kld


if __name__ == "__main__":
    key = jax.random.PRNGKey(0)
    k1, k2, k3, k4 = jax.random.split(key, 4)

    # Small shapes consistent with a VAE forward pass:
    #   reconstructed image / target image: NCHW = (2, 4, 16, 16)
    #   latent mean / log-variance:         (2, 32)
    x_recon = jax.random.normal(k1, (2, 4, 16, 16), dtype=jnp.float32)
    x = jax.random.normal(k2, (2, 4, 16, 16), dtype=jnp.float32)
    mu = jax.random.normal(k3, (2, 32), dtype=jnp.float32)
    logvar = 0.1 * jax.random.normal(k4, (2, 32), dtype=jnp.float32)

    loss = custom_loss(x_recon, x, mu, logvar)
    loss = jax.block_until_ready(loss)

    ref = _ref_loss(x_recon, x, mu, logvar)
    assert jnp.allclose(loss, ref, rtol=1e-5, atol=1e-5), (loss, ref)

    print("KERNEL_OK")
</pallas_src>

<mosaic_0001>
module attributes {stable_mosaic.version = 11 : i64} {
  func.func @_vae_loss_kernel(%arg0: i32, %arg1: i32, %arg2: memref<16x128xf32, #tpu.memory_space<vmem>>, %arg3: memref<16x128xf32, #tpu.memory_space<vmem>>, %arg4: memref<1x64xf32, #tpu.memory_space<vmem>>, %arg5: memref<1x64xf32, #tpu.memory_space<vmem>>, %arg6: memref<8x128xf32, #tpu.memory_space<vmem>>, %arg7: memref<8x128xf32, #tpu.memory_space<vmem>>) attributes {dimension_semantics = [#tpu.dimension_semantics<parallel>, #tpu.dimension_semantics<arbitrary>], iteration_bounds = array<i64: 1, 1>, scalar_prefetch = 0 : i64, scratch_operands = 1 : i64, tpu.core_type = #tpu.core_type<tc>, window_params = [{transform_indices = @transform_0, window_bounds = array<i64: 16, 128>}, {transform_indices = @transform_1, window_bounds = array<i64: 16, 128>}, {pipeline_mode = #tpu.pipeline_mode<synchronous>, transform_indices = @transform_2, window_bounds = array<i64: 1, 64>}, {pipeline_mode = #tpu.pipeline_mode<synchronous>, transform_indices = @transform_3, window_bounds = array<i64: 1, 64>}, {transform_indices = @transform_4, window_bounds = array<i64: 8, 128>}]} {
    %c0_i32 = arith.constant 0 : i32
    %0 = arith.cmpi eq, %arg1, %c0_i32 : i32
    %1 = arith.extui %0 : i1 to i32
    %c0_i32_0 = arith.constant 0 : i32
    %2 = arith.cmpi ne, %1, %c0_i32_0 : i32
    scf.if %2 {
      %cst_10 = arith.constant 0.000000e+00 : f32
      %15 = vector.broadcast %cst_10 : f32 to vector<8x128xf32>
      %c0_11 = arith.constant 0 : index
      %c0_12 = arith.constant 0 : index
      %16 = vector.load %arg7[%c0_11, %c0_12] : memref<8x128xf32, #tpu.memory_space<vmem>>, vector<8x128xf32>
      tpu.vector_store %arg7[%c0_11, %c0_12], %15 {strides = array<i32>} : memref<8x128xf32, #tpu.memory_space<vmem>>, vector<8x128xf32>,
    } else {
    }
    %c0 = arith.constant 0 : index
    %c0_1 = arith.constant 0 : index
    %3 = vector.load %arg2[%c0, %c0_1] : memref<16x128xf32, #tpu.memory_space<vmem>>, vector<16x128xf32>
    %c0_2 = arith.constant 0 : index
    %c0_3 = arith.constant 0 : index
    %4 = vector.load %arg3[%c0_2, %c0_3] : memref<16x128xf32, #tpu.memory_space<vmem>>, vector<16x128xf32>
    %5 = arith.subf %3, %4 : vector<16x128xf32>
    %6 = arith.mulf %5, %5 : vector<16x128xf32>
    %c0_4 = arith.constant 0 : index
    %c0_5 = arith.constant 0 : index
    %7 = vector.load %arg7[%c0_4, %c0_5] : memref<8x128xf32, #tpu.memory_space<vmem>>, vector<8x128xf32>
    %8 = vector.shape_cast %6 : vector<16x128xf32> to vector<2x8x128xf32>
    %cst = arith.constant dense<0.000000e+00> : vector<8x128xf32>
    %9 = vector.multi_reduction <add>, %8, %cst [0] : vector<2x8x128xf32> to vector<8x128xf32>
    %10 = arith.addf %7, %9 : vector<8x128xf32>
    %c0_6 = arith.constant 0 : index
    %c0_7 = arith.constant 0 : index
    %11 = vector.load %arg7[%c0_6, %c0_7] : memref<8x128xf32, #tpu.memory_space<vmem>>, vector<8x128xf32>
    tpu.vector_store %arg7[%c0_6, %c0_7], %10 {strides = array<i32>} : memref<8x128xf32, #tpu.memory_space<vmem>>, vector<8x128xf32>,
    %c0_i32_8 = arith.constant 0 : i32
    %12 = arith.cmpi eq, %arg1, %c0_i32_8 : i32
    %13 = arith.extui %12 : i1 to i32
    %c0_i32_9 = arith.constant 0 : i32
    %14 = arith.cmpi ne, %13, %c0_i32_9 : i32
    scf.if %14 {
      %c0_10 = arith.constant 0 : index
      %c0_11 = arith.constant 0 : index
      %15 = vector.load %arg4[%c0_10, %c0_11] : memref<1x64xf32, #tpu.memory_space<vmem>>, vector<1x64xf32>
      %c0_12 = arith.constant 0 : index
      %c0_13 = arith.constant 0 : index
      %16 = vector.load %arg5[%c0_12, %c0_13] : memref<1x64xf32, #tpu.memory_space<vmem>>, vector<1x64xf32>
      %cst_14 = arith.constant 1.000000e+00 : f32
      %17 = vector.broadcast %cst_14 : f32 to vector<1x64xf32>
      %18 = arith.addf %17, %16 : vector<1x64xf32>
      %19 = arith.mulf %15, %15 : vector<1x64xf32>
      %20 = arith.subf %18, %19 : vector<1x64xf32>
      %21 = math.exp %16 : vector<1x64xf32>
      %22 = arith.subf %20, %21 : vector<1x64xf32>
      %23 = vector.shape_cast %22 : vector<1x64xf32> to vector<1x1x64xf32>
      %cst_15 = arith.constant dense<0.000000e+00> : vector<1xf32>
      %24 = vector.multi_reduction <add>, %23, %cst_15 [1, 2] : vector<1x1x64xf32> to vector<1xf32>
      %25 = vector.shape_cast %24 : vector<1xf32> to vector<1x1x1xf32>
      %26 = vector.extract %25[0, 0, 0] : f32 from vector<1x1x1xf32>
      %cst_16 = arith.constant -5.000000e-01 : f32
      %27 = arith.mulf %cst_16, %26 : f32
      %c0_i32_17 = arith.constant 0 : i32
      %28 = arith.cmpi eq, %arg0, %c0_i32_17 : i32
      %cst_18 = arith.constant 0.000000e+00 : f32
      %29 = arith.select %28, %27, %cst_18 : f32
      %30 = tpu.iota {dimensions = array<i32: 0>} : vector<8x128xi32>
      %31 = tpu.iota {dimensions = array<i32: 1>} : vector<8x128xi32>
      %c0_19 = arith.constant 0 : index
      %c0_20 = arith.constant 0 : index
      %32 = vector.load %arg7[%c0_19, %c0_20] : memref<8x128xf32, #tpu.memory_space<vmem>>, vector<8x128xf32>
      %c0_i32_21 = arith.constant 0 : i32
      %33 = vector.broadcast %c0_i32_21 : i32 to vector<8x128xi32>
      %34 = arith.cmpi eq, %30, %33 : vector<8x128xi32>
      %c0_i32_22 = arith.constant 0 : i32
      %35 = vector.broadcast %c0_i32_22 : i32 to vector<8x128xi32>
      %36 = arith.cmpi eq, %31, %35 : vector<8x128xi32>
      %37 = arith.andi %34, %36 : vector<8x128xi1>
      %cst_23 = arith.constant 0.000000e+00 : f32
      %38 = vector.broadcast %29 : f32 to vector<8x128xf32>
      %39 = vector.broadcast %cst_23 : f32 to vector<8x128xf32>
      %40 = arith.select %37, %38, %39 : vector<8x128xi1>, vector<8x128xf32>
      %41 = arith.addf %32, %40 : vector<8x128xf32>
      %c0_24 = arith.constant 0 : index
      %c0_25 = arith.constant 0 : index
      %42 = vector.load %arg6[%c0_24, %c0_25] : memref<8x128xf32, #tpu.memory_space<vmem>>, vector<8x128xf32>
      tpu.vector_store %arg6[%c0_24, %c0_25], %41 {strides = array<i32>} : memref<8x128xf32, #tpu.memory_space<vmem>>, vector<8x128xf32>,
    } else {
    }
    return
  }
  func.func @transform_0(%arg0: i32, %arg1: i32) -> (i32, i32) {
    %c1_i32 = arith.constant 1 : i32
    %0 = arith.muli %arg0, %c1_i32 : i32
    %1 = arith.addi %0, %arg1 : i32
    %c0_i32 = arith.constant 0 : i32
    %c0_i32_0 = arith.constant 0 : i32
    return %1, %c0_i32 : i32, i32
  }
  func.func @transform_1(%arg0: i32, %arg1: i32) -> (i32, i32) {
    %c1_i32 = arith.constant 1 : i32
    %0 = arith.muli %arg0, %c1_i32 : i32
    %1 = arith.addi %0, %arg1 : i32
    %c0_i32 = arith.constant 0 : i32
    %c0_i32_0 = arith.constant 0 : i32
    return %1, %c0_i32 : i32, i32
  }
  func.func @transform_2(%arg0: i32, %arg1: i32) -> (i32, i32) {
    %c0_i32 = arith.constant 0 : i32
    %c0_i32_0 = arith.constant 0 : i32
    %c0_i32_1 = arith.constant 0 : i32
    return %c0_i32, %c0_i32_0 : i32, i32
  }
  func.func @transform_3(%arg0: i32, %arg1: i32) -> (i32, i32) {
    %c0_i32 = arith.constant 0 : i32
    %c0_i32_0 = arith.constant 0 : i32
    %c0_i32_1 = arith.constant 0 : i32
    return %c0_i32, %c0_i32_0 : i32, i32
  }
  func.func @transform_4(%arg0: i32, %arg1: i32) -> (i32, i32) {
    %c0_i32 = arith.constant 0 : i32
    %c0_i32_0 = arith.constant 0 : i32
    return %arg0, %c0_i32 : i32, i32
  }
}

</mosaic_0001>

<bundles_post_ra>
// kernel: tpu_custom_call.1
= control target key start
LH: loop header
LB: loop body
LE: loop exit
PB: predicated region body
PF: predicated region fallthrough
CT: control target
= control target key end

     0   :  { %9 = vsyncpa [#allocation4], 0  ;;  %s281_s0 = inlined_call_operand.hbm [shape: f32[16,128], index: 0, kind: input, shape index: {}]   ;;  %s282_s1 = inlined_call_operand.hbm [shape: f32[16,128], index: 1, kind: input, shape index: {}]   ;;  %s283_s2 = inlined_call_operand.vmem [shape: f32[1,64], index: 2, kind: input, shape index: {}]   ;;  %s284_s3 = inlined_call_operand.vmem [shape: f32[1,64], index: 3, kind: input, shape index: {}]   ;;  %s285_s4 = inlined_call_operand.hbm [shape: f32[8,128], index: 4, kind: output, shape index: {}]  }
   0x1   :  { %10 = vsyncpa [#allocation7], 0 }
   0x2   :  { %11 = vsyncpa [#allocation5], 0  ;;  %s209_s15 = smov [#allocation3]   ;;  %s137_s19 = scalar_lea.hbm %s281_s0, 256 }
   0x3   :  { %s21_s16 = sshll.u32 %s209_s15, 4  ;;  %p138_p0 = scmp.ne.s32.totalorder %s281_s0, %s137_s19  ;;  %s22_s16 = int_to_ptr.vmem [resolvable:$true] %s21_s16 }
   0x4   :  { %p141_p1 = scmp.lt.u32.totalorder %s137_s19, %s281_s0 }
   0x6   :  { %p143_p2 = pnand %p141_p1, %p138_p0 }
   0x8   :  { %146 = shalt.err (!%p143_p2)
}
   0x9   :  { %s147_s24 = scalar_lea.vmem %s22_s16, 256  ;;  %p152_p4 = scmp.lt.s32.totalorder %s22_s16, %s22_s16 }
   0xa   :  { %p148_p3 = scmp.ne.s32.totalorder %s22_s16, %s147_s24  ;;  %p153_p5 = scmp.lt.s32.totalorder %s147_s24, %s147_s24 }
   0xc   :  { %p154_p6 = por %p153_p5, %p152_p4 }
   0xe   :  { %p155_p7 = pnand %p154_p6, %p148_p3 }
  0x10   :  { %158 = shalt.err (!%p155_p7)
}
  0x11   :  { %s210_s25 = smov 128   ;;  %s211_s26 = smov 8  }
  0x12   :  { %27 = dma.hbm_to_vmem [thread:$0]  %s281_s0, 256, %s22_s16, [#allocation4], %s210_s25, %s210_s25, %s211_s26  }
  0x13   :  { %s212_s29 = smov [#allocation6]   ;;  %s159_s7 = scalar_lea.hbm %s282_s1, 256 }
  0x14   :  { %s37_s30 = sshll.u32 %s212_s29, 4  ;;  %p160_p8 = scmp.ne.s32.totalorder %s282_s1, %s159_s7  ;;  %s38_s30 = int_to_ptr.vmem [resolvable:$true] %s37_s30 }
  0x15   :  { %p163_p9 = scmp.lt.u32.totalorder %s159_s7, %s282_s1 }
  0x17   :  { %p165_p10 = pnand %p163_p9, %p160_p8 }
  0x19   :  { %168 = shalt.err (!%p165_p10)
}
  0x1a   :  { %s169_s12 = scalar_lea.vmem %s38_s30, 256  ;;  %p174_p12 = scmp.lt.s32.totalorder %s38_s30, %s38_s30 }
  0x1b   :  { %p170_p11 = scmp.ne.s32.totalorder %s38_s30, %s169_s12  ;;  %p175_p13 = scmp.lt.s32.totalorder %s169_s12, %s169_s12 }
  0x1d   :  { %p176_p0 = por %p175_p13, %p174_p12 }
  0x1f   :  { %p177_p1 = pnand %p176_p0, %p170_p11 }
  0x21   :  { %180 = shalt.err (!%p177_p1)
}
  0x22   :  { %43 = dma.hbm_to_vmem [thread:$0]  %s282_s1, 256, %s38_s30, [#allocation7], %s210_s25, %s210_s25, %s211_s26  }
  0x23   :  { %203 = dma.done.wait [#allocation4], 256  }
  0x24   :  { %204 = vsyncadd [#allocation4], 4294967040 }
  0x25   :  { %205 = dma.done.wait [#allocation7], 256  }
  0x26   :  { %206 = vsyncadd [#allocation7], 4294967040  ;;  %v79_v0 = vld [vmem:[%s284_s3] sm:$0x1]  ;;  %vm86_vm0 = vcmask 516096   ;;  %v64_v17 = vld [vmem:[#allocation3 + $0x8] sm:$0xff]  ;;  %v100_v20 = vlaneseq }
  0x27   :  { %v83_v1 = vmul.f32 1.442695, %v79_v0  ;;  %v78_v2 = vld [vmem:[%s283_s2] sm:$0x1]  ;;  %v80_v3 = vadd.f32 1.0, %v79_v0  ;;  %v65_v18 = vld [vmem:[#allocation6] sm:$0xff] }
  0x28   :  { %v81_v4 = vmul.f32 %v78_v2, %v78_v2  ;;  %v63_v16 = vld [vmem:[#allocation3] sm:$0xff]  ;;  %v66_v19 = vld [vmem:[#allocation6 + $0x8] sm:$0xff]  ;;  %v101_v23 = vshrl.u32 %v100_v20, 7  ;;  %v103_v24 = vand.u32 127, %v100_v20  ;;  %s213_s3 = smov [#allocation8]  }
  0x29   :  { %135 = vpow2.f32 %v83_v1  ;;  %v67_v21 = vsub.f32 %v63_v16, %v65_v18  ;;  %v68_v22 = vsub.f32 %v64_v17, %v66_v19  ;;  %s118_s18 = sshll.u32 %s213_s3, 4  ;;  %s119_s18 = int_to_ptr.vmem [resolvable:$true] %s118_s18 }
  0x2a   :  { %v82_v5 = vsub.f32 %v80_v3, %v81_v4  ;;  %vm105_vm1 = vcmp.eq.s32.totalorder %v101_v23, 0  ;;  %vm106_vm2 = vcmp.eq.s32.totalorder %v103_v24, 0  ;;  %s181_s19 = scalar_lea.vmem %s119_s18, 128  ;;  %p186_p3 = scmp.lt.s32.totalorder %s119_s18, %s119_s18 }
  0x2b   :  { %v69_v25 = vmul.f32 %v67_v21, %v67_v21  ;;  %v70_v26 = vmul.f32 %v68_v22, %v68_v22  ;;  %vm107_vm3 = vmand %vm105_vm1, %vm106_vm2  ;;  %p182_p2 = scmp.ne.s32.totalorder %s119_s18, %s181_s19  ;;  %p187_p4 = scmp.lt.s32.totalorder %s181_s19, %s181_s19 }
  0x2d   :  { %v72_v27 = vadd.f32 %v70_v26, %v69_v25  ;;  %p188_p5 = por %p187_p4, %p186_p3 }
  0x2f   :  { %p189_p6 = pnand %p188_p5, %p182_p2 }
  0x33   :  { %v136_v6 = vpop.eup %135 }
  0x34   :  { %v85_v7 = vsub.f32 %v82_v5, %v136_v6 }
  0x36   :  { %v87_v8 = vsel %vm86_vm0, %v85_v7, 0.0 }
  0x37   :  { %88 = vadd.xlane.f32.xlu0 %v87_v8 }
  0xc4   :  { %v89_v9 = vpop.xlane.xlu0 %88 }
  0xc5   :  { %v90_v10 = vrot.slane %v89_v9, 4 }
  0xc7   :  { %v91_v11 = vadd.f32 %v90_v10, %v89_v9 }
  0xc9   :  { %v92_v12 = vrot.slane %v91_v11, 2 }
  0xcb   :  { %v93_v13 = vadd.f32 %v92_v12, %v91_v11 }
  0xcd   :  { %v94_v14 = vrot.slane %v93_v13, 1 }
  0xcf   :  { %v95_v15 = vadd.f32 %v94_v14, %v93_v13 }
  0xd1   :  { %128 = vpush %v95_v15 }
 0x102   :  { %s129_s1 = spop %128 }
 0x103   :  { %s97_s2 = smul.f32 -0.5, %s129_s1 }
 0x105   :  { %v108_v28 = vstv %s97_s2 }
 0x106   :  { %v109_v29 = vsel %vm107_vm3, %v108_v28, 0.0 }
 0x107   :  { %v110_v30 = vadd.f32 %v109_v29, %v72_v27 }
 0x109   :  { %111 = vst [vmem:[#allocation8] sm:$0xff] %v110_v30 }
 0x10a   :  { %192 = shalt.err (!%p189_p6)
}
 0x10b   :  { %s193_s22 = scalar_lea.hbm %s285_s4, 128 }
 0x10c   :  { %p194_p7 = scmp.ne.s32.totalorder %s285_s4, %s193_s22  ;;  %p197_p8 = scmp.lt.u32.totalorder %s193_s22, %s285_s4 }
 0x10e   :  { %p199_p9 = pnand %p197_p8, %p194_p7 }
 0x110   :  { %202 = shalt.err (!%p199_p9)
}
 0x111   :  { %121 = dma.vmem_to_hbm [thread:$0]  %s119_s18, 128, %s285_s4, [#allocation5]  }
 0x112   :  { %207 = dma.done.wait [#allocation5], 128  }
 0x113   :  { %208 = vsyncadd [#allocation5], 4294967168 }
 0x114   :  { %125 = vsyncpa [#allocation4], 1 }
 0x115   :  { %126 = vsyncpa [#allocation7], 1 }
 0x116   :  { %127 = vsyncpa [#allocation5], 1 }

</bundles_post_ra>
